<compile_context>
chip_gen: v7x
topology: tpu7x:2x2x1
jax: 0.10.0
libtpu: 0.0.40
codegen_flags: <defaults>
</compile_context>

<pallas_src>
import functools
from typing import NamedTuple

import jax
import jax.numpy as jnp
from jax import lax
from jax.experimental import pallas as pl
from jax.experimental.pallas import tpu as pltpu


def _round_up(a: int, b: int) -> int:
    return (a + b - 1) // b * b


def _rramsim_kernel(seed_ref, x_ref, w_ref, av_ref, b_ref, o_ref, acc_ref,
                    *, noise_amp: float):
    j = pl.program_id(1)            # N tile
    k = pl.program_id(2)            # K tile (reduction, innermost)
    nk = pl.num_programs(2)

    tkb, tnb = w_ref.shape          # static tile dims

    # --- RRAM write noise: stateless counter hash, no HBM noise array -------
    # Keyed on (seed, global_row, global_col): independent of the tiling and
    # of the batch tile => one simulated "write" per forward call.
    rows = (lax.broadcasted_iota(jnp.int32, (tkb, tnb), 0) + k * tkb)
    cols = (lax.broadcasted_iota(jnp.int32, (tkb, tnb), 1) + j * tnb)
    r = rows.astype(jnp.uint32)
    c = cols.astype(jnp.uint32)
    s = seed_ref[0].astype(jnp.uint32)

    h = (r * jnp.uint32(0x9E3779B1)
         + c * jnp.uint32(0x85EBCA77)
         + s * jnp.uint32(0xC2B2AE3D))
    h = h ^ (h >> 16)
    h = h * jnp.uint32(0x7FEB352D)
    h = h ^ (h >> 15)
    h = h * jnp.uint32(0x846CA68B)
    h = h ^ (h >> 16)

    # Exponent splice: top 23 bits -> f32 in [1, 2); map to [-amp, amp).
    fbits = (h >> 9) | jnp.uint32(0x3F800000)
    u12 = lax.bitcast_convert_type(fbits, jnp.float32)            # [1, 2)
    noise = (u12 - jnp.float32(1.5)) * jnp.float32(2.0 * noise_amp)

    # hardtanh(weight + noise, -1, 1) in f32; cast to bf16 only at the MXU.
    w_f32 = w_ref[...].astype(jnp.float32)
    w_noisy = jnp.clip(w_f32 + noise, -1.0, 1.0).astype(jnp.bfloat16)

    part = jnp.dot(x_ref[...], w_noisy, preferred_element_type=jnp.float32)

    @pl.when(k == 0)
    def _():
        acc_ref[...] = part          # init with first partial (no memset+add)

    @pl.when(k > 0)
    def _():
        acc_ref[...] = acc_ref[...] + part

    @pl.when(k == nk - 1)
    def _():
        o_ref[...] = (av_ref[...] * acc_ref[...] + b_ref[...]).astype(o_ref.dtype)


class RRAMParams(NamedTuple):
    weight_p: jax.Array     # (Kp, Np) bf16, padded & cast once
    av_p: jax.Array         # (1, Np) f32
    bias_p: jax.Array       # (1, Np) f32
    in_features: int
    out_features: int
    tk: int
    tn: int


def prepare_rram_params(weight, av, bias=None, *, tk: int = 1024, tn: int = 512):
    """One-time parameter prep: cast weight to bf16 + pad to tile multiples.

    Hoists the per-call pad/cast pass over the weight out of the forward path.
    """
    K, N = weight.shape
    tk = min(tk, _round_up(K, 128))
    tn = min(tn, _round_up(N, 128))
    # Keep >= 2 N tiles when the output is wide enough (v7x: 2 TensorCores).
    if tn >= 256 and _round_up(N, tn) // tn == 1 and (tn // 2) % 128 == 0:
        tn //= 2
    Kp, Np = _round_up(K, tk), _round_up(N, tn)

    wp = weight.astype(jnp.bfloat16)
    if (Kp, Np) != (K, N):
        wp = jnp.pad(wp, ((0, Kp - K), (0, Np - N)))

    avp = av.astype(jnp.float32)
    bp = (jnp.zeros((N,), jnp.float32) if bias is None
          else bias.astype(jnp.float32))
    if Np != N:
        avp = jnp.pad(avp, (0, Np - N))
        bp = jnp.pad(bp, (0, Np - N))
    return RRAMParams(wp, avp.reshape(1, Np), bp.reshape(1, Np), K, N, tk, tn)


def _vmem_limit_bytes(tm: int, tk: int, tn: int) -> int:
    # Double-buffered bf16 x/w tiles + f32 out tiles + f32 accumulator +
    # headroom for the f32 noise-path temporaries over a (tk, tn) tile.
    tiles = 2 * (tm * tk * 2 + tk * tn * 2 + tm * tn * 4 + 2 * tn * 4) + tm * tn * 4
    temps = 8 * tk * tn * 4
    est = tiles + temps + (4 << 20)
    return int(min(48 * 1024 * 1024, max(est, 32 * 1024 * 1024)))


def rramsim_forward(x, params: RRAMParams, seed, *, tm: int = 256,
                    noise_amp: float = 0.04):
    """RRAMsim forward: x (B, in) -> (B, out) = Av * (x @ hardtanh(W + noise)) + b.

    `seed` selects the per-call write-noise draw; pass a fresh seed per call to
    mimic torch's per-call rand().
    """
    B, K = x.shape
    assert K == params.in_features, (K, params.in_features)
    Kp, Np = params.weight_p.shape
    N = params.out_features
    tk, tn = params.tk, params.tn

    # tm capped so the M grid dim stays 1 for realistic batch sizes; 16-row
    # alignment keeps bf16 sublane packing happy.
    tm = min(tm, _round_up(B, 16))
    Bp = _round_up(B, tm)

    xp = x.astype(jnp.bfloat16)
    if (Bp, Kp) != (B, K):
        xp = jnp.pad(xp, ((0, Bp - B), (0, Kp - K)))

    seed_arr = jnp.asarray(seed, dtype=jnp.int32).reshape((1,))
    grid = (Bp // tm, Np // tn, Kp // tk)
    kernel = functools.partial(_rramsim_kernel, noise_amp=noise_amp)

    out = pl.pallas_call(
        kernel,
        out_shape=jax.ShapeDtypeStruct((Bp, Np), jnp.float32),
        grid_spec=pltpu.PrefetchScalarGridSpec(
            num_scalar_prefetch=1,                                  # seed -> SMEM
            grid=grid,
            in_specs=[
                pl.BlockSpec((tm, tk), lambda i, j, k, s: (i, k)),   # x (bf16)
                pl.BlockSpec((tk, tn), lambda i, j, k, s: (k, j)),   # weight (bf16)
                pl.BlockSpec((1, tn), lambda i, j, k, s: (0, j)),    # Av (f32)
                pl.BlockSpec((1, tn), lambda i, j, k, s: (0, j)),    # bias (f32)
            ],
            out_specs=pl.BlockSpec((tm, tn), lambda i, j, k, s: (i, j)),
            scratch_shapes=[pltpu.VMEM((tm, tn), jnp.float32)],      # f32 acc
        ),
        compiler_params=pltpu.CompilerParams(
            dimension_semantics=("parallel", "parallel", "arbitrary"),
            vmem_limit_bytes=_vmem_limit_bytes(tm, tk, tn),
        ),
    )(seed_arr, xp, params.weight_p, params.av_p, params.bias_p)

    if (Bp, Np) != (B, N):
        out = out[:B, :N]
    return out


if __name__ == "__main__":
    key = jax.random.PRNGKey(0)
    k_x, k_w = jax.random.split(key, 2)

    batch = 8
    in_features = 32
    out_features = 128

    # Matches the torch module's __init__: weight ~ randn(in, out),
    # Av = 0.1 * ones(out), bias = zeros(out).
    weight = jax.random.normal(k_w, (in_features, out_features), dtype=jnp.float32)
    av = 0.1 * jnp.ones((out_features,), dtype=jnp.float32)
    bias = jnp.zeros((out_features,), dtype=jnp.float32)
    x = jax.random.normal(k_x, (batch, in_features), dtype=jnp.float32)

    # One-time parameter prep (hoisted out of the per-call path).
    params = prepare_rram_params(weight, av, bias)

    y = jax.block_until_ready(rramsim_forward(x, params, seed=1234))
    assert y.shape == (batch, out_features)
    assert bool(jnp.all(jnp.isfinite(y)))

    # (1) Same seed -> identical output (noise is a pure function of the seed
    #     and the global element indices).
    y2 = jax.block_until_ready(rramsim_forward(x, params, seed=1234))
    assert jnp.array_equal(y, y2)

    # (2) Different seed -> different output (noise path is live).
    y3 = jax.block_until_ready(rramsim_forward(x, params, seed=4321))
    assert not jnp.array_equal(y, y3)

    # (3) Analytic bound vs the noiseless f32 reference: hardtanh is
    #     1-Lipschitz so |clip(w+n)-clip(w)| <= 0.04; per-output deviation is
    #     bounded by Av * (0.04 + bf16 cast/matmul slop) * sum_k |x_k|.
    y0 = av * (x @ jnp.clip(weight, -1.0, 1.0)) + bias
    row_l1 = jnp.sum(jnp.abs(x), axis=1, keepdims=True)            # (B, 1)
    bound = av[None, :] * (0.04 + 0.02) * row_l1 + 2e-2
    dev = jnp.abs(y - y0)
    assert bool(jnp.all(dev <= bound)), (float(jnp.max(dev)), float(jnp.min(bound)))
    assert float(jnp.max(dev)) > 1e-4      # noise was actually applied

    print("KERNEL_OK")
</pallas_src>

<mosaic_0001>
module attributes {stable_mosaic.version = 11 : i64} {
  func.func @_rramsim_kernel(%arg0: i32, %arg1: i32, %arg2: i32, %arg3: memref<1xi32, #tpu.memory_space<smem>>, %arg4: memref<16x128xbf16, #tpu.memory_space<vmem>>, %arg5: memref<128x128xbf16, #tpu.memory_space<vmem>>, %arg6: memref<1x128xf32, #tpu.memory_space<vmem>>, %arg7: memref<1x128xf32, #tpu.memory_space<vmem>>, %arg8: memref<16x128xf32, #tpu.memory_space<vmem>>, %arg9: memref<16x128xf32, #tpu.memory_space<vmem>>) attributes {dimension_semantics = [#tpu.dimension_semantics<parallel>, #tpu.dimension_semantics<parallel>, #tpu.dimension_semantics<arbitrary>], iteration_bounds = array<i64: 1, 1, 1>, scalar_prefetch = 1 : i64, scratch_operands = 1 : i64, tpu.core_type = #tpu.core_type<tc>, window_params = [{transform_indices = @transform_0, window_bounds = array<i64: 16, 128>}, {transform_indices = @transform_1, window_bounds = array<i64: 128, 128>}, {transform_indices = @transform_2, window_bounds = array<i64: 1, 128>}, {transform_indices = @transform_3, window_bounds = array<i64: 1, 128>}, {transform_indices = @transform_4, window_bounds = array<i64: 16, 128>}]} {
    %0 = tpu.iota {dimensions = array<i32: 0>} : vector<128x128xi32>
    %c128_i32 = arith.constant 128 : i32
    %1 = arith.muli %arg2, %c128_i32 : i32
    %2 = vector.broadcast %1 : i32 to vector<128x128xi32>
    %3 = arith.addi %0, %2 : vector<128x128xi32>
    %4 = tpu.iota {dimensions = array<i32: 1>} : vector<128x128xi32>
    %c128_i32_0 = arith.constant 128 : i32
    %5 = arith.muli %arg1, %c128_i32_0 : i32
    %6 = vector.broadcast %5 : i32 to vector<128x128xi32>
    %7 = arith.addi %4, %6 : vector<128x128xi32>
    %c0 = arith.constant 0 : index
    %8 = memref.load %arg3[%c0] : memref<1xi32, #tpu.memory_space<smem>>
    %c-1640531535_i32 = arith.constant -1640531535 : i32
    %9 = vector.broadcast %c-1640531535_i32 : i32 to vector<128x128xi32>
    %10 = arith.muli %3, %9 : vector<128x128xi32>
    %c-2048144777_i32 = arith.constant -2048144777 : i32
    %11 = vector.broadcast %c-2048144777_i32 : i32 to vector<128x128xi32>
    %12 = arith.muli %7, %11 : vector<128x128xi32>
    %13 = arith.addi %10, %12 : vector<128x128xi32>
    %c-1028477379_i32 = arith.constant -1028477379 : i32
    %14 = arith.muli %8, %c-1028477379_i32 : i32
    %15 = vector.broadcast %14 : i32 to vector<128x128xi32>
    %16 = arith.addi %13, %15 : vector<128x128xi32>
    %c16_i32 = arith.constant 16 : i32
    %17 = vector.broadcast %c16_i32 : i32 to vector<128x128xi32>
    %18 = arith.shrui %16, %17 : vector<128x128xi32>
    %19 = arith.xori %16, %18 : vector<128x128xi32>
    %c2146121005_i32 = arith.constant 2146121005 : i32
    %20 = vector.broadcast %c2146121005_i32 : i32 to vector<128x128xi32>
    %21 = arith.muli %19, %20 : vector<128x128xi32>
    %c15_i32 = arith.constant 15 : i32
    %22 = vector.broadcast %c15_i32 : i32 to vector<128x128xi32>
    %23 = arith.shrui %21, %22 : vector<128x128xi32>
    %24 = arith.xori %21, %23 : vector<128x128xi32>
    %c-2073254261_i32 = arith.constant -2073254261 : i32
    %25 = vector.broadcast %c-2073254261_i32 : i32 to vector<128x128xi32>
    %26 = arith.muli %24, %25 : vector<128x128xi32>
    %c16_i32_1 = arith.constant 16 : i32
    %27 = vector.broadcast %c16_i32_1 : i32 to vector<128x128xi32>
    %28 = arith.shrui %26, %27 : vector<128x128xi32>
    %29 = arith.xori %26, %28 : vector<128x128xi32>
    %c9_i32 = arith.constant 9 : i32
    %30 = vector.broadcast %c9_i32 : i32 to vector<128x128xi32>
    %31 = arith.shrui %29, %30 : vector<128x128xi32>
    %c1065353216_i32 = arith.constant 1065353216 : i32
    %32 = vector.broadcast %c1065353216_i32 : i32 to vector<128x128xi32>
    %33 = arith.ori %31, %32 : vector<128x128xi32>
    %34 = tpu.bitcast %33 : vector<128x128xi32> -> vector<128x128xf32>
    %cst = arith.constant 1.500000e+00 : f32
    %35 = vector.broadcast %cst : f32 to vector<128x128xf32>
    %36 = arith.subf %34, %35 : vector<128x128xf32>
    %cst_2 = arith.constant 8.000000e-02 : f32
    %37 = vector.broadcast %cst_2 : f32 to vector<128x128xf32>
    %38 = arith.mulf %36, %37 : vector<128x128xf32>
    %c0_3 = arith.constant 0 : index
    %c0_4 = arith.constant 0 : index
    %39 = vector.load %arg5[%c0_3, %c0_4] : memref<128x128xbf16, #tpu.memory_space<vmem>>, vector<128x128xbf16>
    %40 = arith.extf %39 : vector<128x128xbf16> to vector<128x128xf32>
    %41 = arith.addf %40, %38 : vector<128x128xf32>
    %cst_5 = arith.constant -1.000000e+00 : f32
    %cst_6 = arith.constant 1.000000e+00 : f32
    %42 = vector.broadcast %cst_5 : f32 to vector<128x128xf32>
    %43 = arith.maximumf %42, %41 : vector<128x128xf32>
    %44 = vector.broadcast %cst_6 : f32 to vector<128x128xf32>
    %45 = arith.minimumf %44, %43 : vector<128x128xf32>
    %46 = arith.truncf %45 : vector<128x128xf32> to vector<128x128xbf16>
    %c0_7 = arith.constant 0 : index
    %c0_8 = arith.constant 0 : index
    %47 = vector.load %arg4[%c0_7, %c0_8] : memref<16x128xbf16, #tpu.memory_space<vmem>>, vector<16x128xbf16>
    %cst_9 = arith.constant dense<0.000000e+00> : vector<16x128xf32>
    %48 = tpu.matmul %47, %46, %cst_9 {dimension_numbers = #tpu.dot_dimension_numbers<[1], [0], [0], [1], [0, 0, 1, 1], [], []>} : vector<16x128xbf16>, vector<128x128xbf16>, vector<16x128xf32> -> vector<16x128xf32>
    %c0_i32 = arith.constant 0 : i32
    %49 = arith.cmpi eq, %arg2, %c0_i32 : i32
    %50 = arith.extui %49 : i1 to i32
    %c0_i32_10 = arith.constant 0 : i32
    %51 = arith.cmpi ne, %50, %c0_i32_10 : i32
    scf.if %51 {
      %c0_15 = arith.constant 0 : index
      %c0_16 = arith.constant 0 : index
      %58 = vector.load %arg9[%c0_15, %c0_16] : memref<16x128xf32, #tpu.memory_space<vmem>>, vector<16x128xf32>
      tpu.vector_store %arg9[%c0_15, %c0_16], %48 {strides = array<i32>} : memref<16x128xf32, #tpu.memory_space<vmem>>, vector<16x128xf32>,
    } else {
    }
    %c0_i32_11 = arith.constant 0 : i32
    %52 = arith.cmpi sgt, %arg2, %c0_i32_11 : i32
    %53 = arith.extui %52 : i1 to i32
    %c0_i32_12 = arith.constant 0 : i32
    %54 = arith.cmpi ne, %53, %c0_i32_12 : i32
    scf.if %54 {
      %c0_15 = arith.constant 0 : index
      %c0_16 = arith.constant 0 : index
      %58 = vector.load %arg9[%c0_15, %c0_16] : memref<16x128xf32, #tpu.memory_space<vmem>>, vector<16x128xf32>
      %59 = arith.addf %58, %48 : vector<16x128xf32>
      %c0_17 = arith.constant 0 : index
      %c0_18 = arith.constant 0 : index
      %60 = vector.load %arg9[%c0_17, %c0_18] : memref<16x128xf32, #tpu.memory_space<vmem>>, vector<16x128xf32>
      tpu.vector_store %arg9[%c0_17, %c0_18], %59 {strides = array<i32>} : memref<16x128xf32, #tpu.memory_space<vmem>>, vector<16x128xf32>,
    } else {
    }
    %c0_i32_13 = arith.constant 0 : i32
    %55 = arith.cmpi eq, %arg2, %c0_i32_13 : i32
    %56 = arith.extui %55 : i1 to i32
    %c0_i32_14 = arith.constant 0 : i32
    %57 = arith.cmpi ne, %56, %c0_i32_14 : i32
    scf.if %57 {
      %c0_15 = arith.constant 0 : index
      %c0_16 = arith.constant 0 : index
      %58 = vector.load %arg6[%c0_15, %c0_16] : memref<1x128xf32, #tpu.memory_space<vmem>>, vector<1x128xf32>
      %c0_17 = arith.constant 0 : index
      %c0_18 = arith.constant 0 : index
      %59 = vector.load %arg9[%c0_17, %c0_18] : memref<16x128xf32, #tpu.memory_space<vmem>>, vector<16x128xf32>
      %60 = vector.broadcast %58 : vector<1x128xf32> to vector<16x128xf32>
      %61 = arith.mulf %60, %59 : vector<16x128xf32>
      %c0_19 = arith.constant 0 : index
      %c0_20 = arith.constant 0 : index
      %62 = vector.load %arg7[%c0_19, %c0_20] : memref<1x128xf32, #tpu.memory_space<vmem>>, vector<1x128xf32>
      %63 = vector.broadcast %62 : vector<1x128xf32> to vector<16x128xf32>
      %64 = arith.addf %61, %63 : vector<16x128xf32>
      %c0_21 = arith.constant 0 : index
      %c0_22 = arith.constant 0 : index
      %65 = vector.load %arg8[%c0_21, %c0_22] : memref<16x128xf32, #tpu.memory_space<vmem>>, vector<16x128xf32>
      tpu.vector_store %arg8[%c0_21, %c0_22], %64 {strides = array<i32>} : memref<16x128xf32, #tpu.memory_space<vmem>>, vector<16x128xf32>,
    } else {
    }
    return
  }
  func.func @transform_0(%arg0: i32, %arg1: i32, %arg2: i32, %arg3: memref<1xi32, #tpu.memory_space<smem>>) -> (i32, i32) {
    %c0_i32 = arith.constant 0 : i32
    return %arg0, %arg2 : i32, i32
  }
  func.func @transform_1(%arg0: i32, %arg1: i32, %arg2: i32, %arg3: memref<1xi32, #tpu.memory_space<smem>>) -> (i32, i32) {
    %c0_i32 = arith.constant 0 : i32
    return %arg2, %arg1 : i32, i32
  }
  func.func @transform_2(%arg0: i32, %arg1: i32, %arg2: i32, %arg3: memref<1xi32, #tpu.memory_space<smem>>) -> (i32, i32) {
    %c0_i32 = arith.constant 0 : i32
    %c0_i32_0 = arith.constant 0 : i32
    return %c0_i32, %arg1 : i32, i32
  }
  func.func @transform_3(%arg0: i32, %arg1: i32, %arg2: i32, %arg3: memref<1xi32, #tpu.memory_space<smem>>) -> (i32, i32) {
    %c0_i32 = arith.constant 0 : i32
    %c0_i32_0 = arith.constant 0 : i32
    return %c0_i32, %arg1 : i32, i32
  }
  func.func @transform_4(%arg0: i32, %arg1: i32, %arg2: i32, %arg3: memref<1xi32, #tpu.memory_space<smem>>) -> (i32, i32) {
    %c0_i32 = arith.constant 0 : i32
    return %arg0, %arg1 : i32, i32
  }
}

</mosaic_0001>

<bundles_post_ra>
// kernel: tpu_custom_call.1
= control target key start
LH: loop header
LB: loop body
LE: loop exit
PB: predicated region body
PF: predicated region fallthrough
CT: control target
= control target key end

     0   :  { %11 = vsyncpa [#allocation6], 0  ;;  %s929_s0 = inlined_call_operand.<no memory space> [shape: s32[1], index: 0, kind: input, shape index: {}]   ;;  %s930_s1 = inlined_call_operand.hbm [shape: bf16[16,128], index: 1, kind: input, shape index: {}]   ;;  %s931_s2 = inlined_call_operand.hbm [shape: bf16[128,128], index: 2, kind: input, shape index: {}]   ;;  %s932_s3 = inlined_call_operand.vmem [shape: f32[1,128], index: 3, kind: input, shape index: {}]   ;;  %s933_s4 = inlined_call_operand.vmem [shape: f32[1,128], index: 4, kind: input, shape index: {}]   ;;  %s934_s5 = inlined_call_operand.hbm [shape: f32[16,128], index: 5, kind: output, shape index: {}]  }
   0x1   :  { %12 = vsyncpa [#allocation9], 0 }
   0x2   :  { %13 = vsyncpa [#allocation7], 0  ;;  %s730_s18 = smov [#allocation5]   ;;  %s658_s22 = scalar_lea.hbm %s930_s1, 128 }
   0x3   :  { %s19_s19 = sshll.u32 %s730_s18, 4  ;;  %p659_p0 = scmp.ne.s32.totalorder %s930_s1, %s658_s22  ;;  %s20_s19 = int_to_ptr.vmem [resolvable:$true] %s19_s19 }
   0x4   :  { %p662_p1 = scmp.lt.u32.totalorder %s658_s22, %s930_s1 }
   0x6   :  { %p664_p2 = pnand %p662_p1, %p659_p0 }
   0x8   :  { %667 = shalt.err (!%p664_p2)
}
   0x9   :  { %s668_s27 = scalar_lea.vmem %s20_s19, 128  ;;  %p673_p4 = scmp.lt.s32.totalorder %s20_s19, %s20_s19 }
   0xa   :  { %p669_p3 = scmp.ne.s32.totalorder %s20_s19, %s668_s27  ;;  %p674_p5 = scmp.lt.s32.totalorder %s668_s27, %s668_s27 }
   0xc   :  { %p675_p6 = por %p674_p5, %p673_p4 }
   0xe   :  { %p676_p7 = pnand %p675_p6, %p669_p3 }
  0x10   :  { %679 = shalt.err (!%p676_p7)
}
  0x11   :  { %s731_s28 = smov 64   ;;  %s732_s29 = smov 4  }
  0x12   :  { %25 = dma.hbm_to_vmem [thread:$0]  %s930_s1, 128, %s20_s19, [#allocation6], %s731_s28, %s731_s28, %s732_s29  }
  0x13   :  { %s733_s7 = smov [#allocation8]   ;;  %s680_s11 = scalar_lea.hbm %s931_s2, 1024 }
  0x14   :  { %s31_s8 = sshll.u32 %s733_s7, 4  ;;  %p681_p8 = scmp.ne.s32.totalorder %s931_s2, %s680_s11  ;;  %s32_s8 = int_to_ptr.vmem [resolvable:$true] %s31_s8 }
  0x15   :  { %p684_p9 = scmp.lt.u32.totalorder %s680_s11, %s931_s2 }
  0x17   :  { %p686_p10 = pnand %p684_p9, %p681_p8 }
  0x19   :  { %689 = shalt.err (!%p686_p10)
}
  0x1a   :  { %s690_s16 = scalar_lea.vmem %s32_s8, 1024  ;;  %p695_p12 = scmp.lt.s32.totalorder %s32_s8, %s32_s8 }
  0x1b   :  { %p691_p11 = scmp.ne.s32.totalorder %s32_s8, %s690_s16  ;;  %p696_p13 = scmp.lt.s32.totalorder %s690_s16, %s690_s16 }
  0x1d   :  { %p697_p0 = por %p696_p13, %p695_p12 }
  0x1f   :  { %p698_p1 = pnand %p697_p0, %p691_p11 }
  0x21   :  { %701 = shalt.err (!%p698_p1)
}
  0x22   :  { %37 = dma.hbm_to_vmem [thread:$0]  %s931_s2, 1024, %s32_s8, [#allocation9], %s731_s28, %s731_s28, %s732_s29  }
  0x23   :  { %724 = dma.done.wait [#allocation6], 128  }
  0x24   :  { %725 = vsyncadd [#allocation6], 4294967168 }
  0x25   :  { %726 = dma.done.wait [#allocation9], 1024  }
  0x26   :  { %727 = vsyncadd [#allocation9], 4294966272  ;;  %v49_v0 = vlaneseq  ;;  %v734_v1 = vmov 0.0   ;;  %s123_s20 = smul.u32 3266489917, %s929_s0  ;;  %vm735_vm0 = vmmov 0  }
  0x27   :  { %628 = vmatprep.subr.bf16.mxu0 %v734_v1  ;;  %644 = vmatprep.mubr.msk.bf16.mxu0 %vm735_vm0, %v734_v1  ;;  %v812_v16 = vld [vmem:[#allocation8] sm:$0xff]   ;;  %v814_v18 = vld [vmem:[#allocation8 + $0x8] sm:$0xff]   ;;  %v819_v23 = vld [vmem:[#allocation8 + $0x10] sm:$0xff]   ;;  %s736_s23 = smov [#allocation10]  }
  0x28   :  { %v798_v2 = vshrl.u32 %v49_v0, 7  ;;  %v85_v3 = vand.u32 127, %v49_v0  ;;  %v805_v8 = vstv %s123_s20  ;;  %v582_v22 = vunpack.c.l.bf16 %v812_v16  ;;  %s532_s24 = sshll.u32 %s736_s23, 4  ;;  %s533_s24 = int_to_ptr.vmem [resolvable:$true] %s532_s24 }
  0x29   :  { %v583_v25 = vunpack.c.h.bf16 %v812_v16  ;;  %v586_v28 = vunpack.c.l.bf16 %v814_v18  ;;  %v587_v35 = vunpack.c.h.bf16 %v814_v18  ;;  %v590_v36 = vunpack.c.l.bf16 %v819_v23  ;;  %s702_s25 = scalar_lea.vmem %s533_s24, 256  ;;  %p707_p3 = scmp.lt.s32.totalorder %s533_s24, %s533_s24 }
  0x2a   :  { %v51_v4 = vadd.s32 8, %v798_v2  ;;  %v90_v5 = vmul.u32 2654435761, %v798_v2  ;;  %v802_v6 = vmul.u32 2246822519, %v85_v3  ;;  %v52_v7 = vadd.s32 16, %v798_v2  ;;  %p703_p2 = scmp.ne.s32.totalorder %s533_s24, %s702_s25  ;;  %p708_p4 = scmp.lt.s32.totalorder %s702_s25, %s702_s25 }
  0x2b   :  { %v53_v9 = vadd.s32 24, %v798_v2  ;;  %v54_v10 = vadd.s32 32, %v798_v2  ;;  %v55_v11 = vadd.s32 40, %v798_v2  ;;  %v56_v15 = vadd.s32 48, %v798_v2 }
  0x2c   :  { %v91_v12 = vmul.u32 2654435761, %v51_v4  ;;  %v107_v13 = vadd.s32 %v802_v6, %v90_v5  ;;  %v92_v14 = vmul.u32 2654435761, %v52_v7  ;;  %v57_v24 = vadd.s32 56, %v798_v2  ;;  %p709_p5 = por %p708_p4, %p707_p3 }
  0x2d   :  { %v93_v17 = vmul.u32 2654435761, %v53_v9  ;;  %v94_v19 = vmul.u32 2654435761, %v54_v10 }
  0x2e   :  { %v108_v20 = vadd.s32 %v802_v6, %v91_v12  ;;  %v125_v21 = vadd.s32 %v805_v8, %v107_v13  ;;  %v109_v26 = vadd.s32 %v802_v6, %v92_v14  ;;  %v95_v31 = vmul.u32 2654435761, %v55_v11  ;;  %v839_v13 = vld [vmem:[#allocation8 + $0x18] sm:$0xff]   ;;  %p710_p6 = pnand %p709_p5, %p703_p2 }
  0x2f   :  { %v110_v27 = vadd.s32 %v802_v6, %v93_v17  ;;  %v111_v32 = vadd.s32 %v802_v6, %v94_v19  ;;  %v96_v43 = vmul.u32 2654435761, %v56_v15  ;;  %v97_v44 = vmul.u32 2654435761, %v57_v24 }
  0x30   :  { %v126_v29 = vadd.s32 %v805_v8, %v108_v20  ;;  %v141_v30 = vshrl.u32 %v125_v21, 16  ;;  %v127_v33 = vadd.s32 %v805_v8, %v109_v26  ;;  %v112_v39 = vadd.s32 %v802_v6, %v95_v31 }
  0x31   :  { %v128_v34 = vadd.s32 %v805_v8, %v110_v27  ;;  %v129_v40 = vadd.s32 %v805_v8, %v111_v32  ;;  %v113_v51 = vadd.s32 %v802_v6, %v96_v43  ;;  %v114_v52 = vadd.s32 %v802_v6, %v97_v44 }
  0x32   :  { %v142_v37 = vshrl.u32 %v126_v29, 16  ;;  %v157_v38 = vxor.u32 %v141_v30, %v125_v21  ;;  %v143_v41 = vshrl.u32 %v127_v33, 16  ;;  %v130_v47 = vadd.s32 %v805_v8, %v112_v39 }
  0x33   :  { %v144_v42 = vshrl.u32 %v128_v34, 16  ;;  %v145_v48 = vshrl.u32 %v129_v40, 16  ;;  %v131_v59 = vadd.s32 %v805_v8, %v113_v51  ;;  %v132_v60 = vadd.s32 %v805_v8, %v114_v52 }
  0x34   :  { %v158_v45 = vxor.u32 %v142_v37, %v126_v29  ;;  %v173_v46 = vmul.u32 2146121005, %v157_v38  ;;  %v159_v49 = vxor.u32 %v143_v41, %v127_v33  ;;  %v146_v55 = vshrl.u32 %v130_v47, 16 }
  0x35   :  { %v160_v50 = vxor.u32 %v144_v42, %v128_v34  ;;  %v161_v56 = vxor.u32 %v145_v48, %v129_v40  ;;  %v147_v5 = vshrl.u32 %v131_v59, 16  ;;  %v148_v7 = vshrl.u32 %v132_v60, 16 }
  0x36   :  { %v174_v53 = vmul.u32 2146121005, %v158_v45  ;;  %v189_v54 = vshrl.u32 %v173_v46, 15  ;;  %v175_v57 = vmul.u32 2146121005, %v159_v49  ;;  %v162_v63 = vxor.u32 %v146_v55, %v130_v47 }
  0x37   :  { %v176_v58 = vmul.u32 2146121005, %v160_v50  ;;  %v177_v0 = vmul.u32 2146121005, %v161_v56  ;;  %v163_v17 = vxor.u32 %v147_v5, %v131_v59  ;;  %v164_v19 = vxor.u32 %v148_v7, %v132_v60 }
  0x38   :  { %v190_v61 = vshrl.u32 %v174_v53, 15  ;;  %v205_v62 = vxor.u32 %v189_v54, %v173_v46  ;;  %v191_v3 = vshrl.u32 %v175_v57, 15  ;;  %v178_v11 = vmul.u32 2146121005, %v162_v63 }
  0x39   :  { %v192_v4 = vshrl.u32 %v176_v58, 15  ;;  %v193_v12 = vshrl.u32 %v177_v0, 15  ;;  %v591_v30 = vunpack.c.h.bf16 %v819_v23  ;;  %v594_v31 = vunpack.c.l.bf16 %v839_v13 }
  0x3a   :  { %v206_v9 = vxor.u32 %v190_v61, %v174_v53  ;;  %v221_v10 = vmul.u32 2221713035, %v205_v62  ;;  %v207_v14 = vxor.u32 %v191_v3, %v175_v57  ;;  %v194_v24 = vshrl.u32 %v178_v11, 15 }
  0x3b   :  { %v208_v15 = vxor.u32 %v192_v4, %v176_v58  ;;  %v209_v26 = vxor.u32 %v193_v12, %v177_v0  ;;  %v179_v40 = vmul.u32 2146121005, %v163_v17  ;;  %v180_v41 = vmul.u32 2146121005, %v164_v19 }
  0x3c   :  { %v222_v20 = vmul.u32 2221713035, %v206_v9  ;;  %v237_v21 = vshrl.u32 %v221_v10, 16  ;;  %v223_v27 = vmul.u32 2221713035, %v207_v14  ;;  %v210_v34 = vxor.u32 %v194_v24, %v178_v11 }
  0x3d   :  { %v224_v29 = vmul.u32 2221713035, %v208_v15  ;;  %v225_v37 = vmul.u32 2221713035, %v209_v26  ;;  %v195_v48 = vshrl.u32 %v179_v40, 15  ;;  %v196_v49 = vshrl.u32 %v180_v41, 15 }
  0x3e   :  { %v238_v32 = vshrl.u32 %v222_v20, 16  ;;  %v253_v33 = vxor.u32 %v237_v21, %v221_v10  ;;  %v239_v38 = vshrl.u32 %v223_v27, 16  ;;  %v226_v44 = vmul.u32 2221713035, %v210_v34 }
  0x3f   :  { %v240_v39 = vshrl.u32 %v224_v29, 16  ;;  %v241_v45 = vshrl.u32 %v225_v37, 16  ;;  %v211_v56 = vxor.u32 %v195_v48, %v179_v40  ;;  %v212_v57 = vxor.u32 %v196_v49, %v180_v41 }
  0x40   :  { %v254_v42 = vxor.u32 %v238_v32, %v222_v20  ;;  %v269_v43 = vshrl.u32 %v253_v33, 9  ;;  %v255_v46 = vxor.u32 %v239_v38, %v223_v27  ;;  %v242_v52 = vshrl.u32 %v226_v44, 16 }
  0x41   :  { %v256_v47 = vxor.u32 %v240_v39, %v224_v29  ;;  %v257_v53 = vxor.u32 %v241_v45, %v225_v37  ;;  %v227_v0 = vmul.u32 2221713035, %v211_v56  ;;  %v228_v3 = vmul.u32 2221713035, %v212_v57  ;;  %v864_v57 = vld [vmem:[#allocation8 + $0x28] sm:$0xff]  }
  0x42   :  { %v270_v50 = vshrl.u32 %v254_v42, 9  ;;  %v285_v51 = vor.u32 1065353216, %v269_v43  ;;  %v271_v54 = vshrl.u32 %v255_v46, 9  ;;  %v258_v60 = vxor.u32 %v242_v52, %v226_v44  ;;  %v854_v46 = vld [vmem:[#allocation8 + $0x20] sm:$0xff]  }
  0x43   :  { %v272_v55 = vshrl.u32 %v256_v47, 9  ;;  %v273_v61 = vshrl.u32 %v257_v53, 9  ;;  %v243_v12 = vshrl.u32 %v227_v0, 16  ;;  %v244_v14 = vshrl.u32 %v228_v3, 16 }
  0x44   :  { %v286_v58 = vor.u32 1065353216, %v270_v50  ;;  %v545_v59 = vadd.f32 -1.5, %v285_v51  ;;  %v287_v62 = vor.u32 1065353216, %v271_v54  ;;  %v274_v7 = vshrl.u32 %v258_v60, 9 }
  0x45   :  { %v288_v63 = vor.u32 1065353216, %v272_v55  ;;  %v289_v9 = vor.u32 1065353216, %v273_v61  ;;  %v259_v26 = vxor.u32 %v243_v12, %v227_v0  ;;  %v260_v27 = vxor.u32 %v244_v14, %v228_v3 }
  0x46   :  { %v546_v4 = vadd.f32 -1.5, %v286_v58  ;;  %v333_v5 = vmul.f32 0.08, %v545_v59  ;;  %v547_v10 = vadd.f32 -1.5, %v287_v62  ;;  %v290_v19 = vor.u32 1065353216, %v274_v7 }
  0x47   :  { %v548_v11 = vadd.f32 -1.5, %v288_v63  ;;  %v549_v20 = vadd.f32 -1.5, %v289_v9  ;;  %v275_v39 = vshrl.u32 %v259_v26, 9  ;;  %v58_v43 = vadd.s32 64, %v798_v2 }
  0x48   :  { %v334_v15 = vmul.f32 0.08, %v546_v4  ;;  %v381_v17 = vadd.f32 %v582_v22, %v333_v5  ;;  %v335_v21 = vmul.f32 0.08, %v547_v10  ;;  %v550_v33 = vadd.f32 -1.5, %v290_v19  ;;  %v879_v19 = vld [vmem:[#allocation8 + $0x30] sm:$0xff]  }
  0x49   :  { %v336_v24 = vmul.f32 0.08, %v548_v11  ;;  %v337_v34 = vmul.f32 0.08, %v549_v20  ;;  %v276_v22 = vshrl.u32 %v260_v27, 9  ;;  %v291_v44 = vor.u32 1065353216, %v275_v39 }
  0x4a   :  { %v382_v29 = vadd.f32 %v583_v25, %v334_v15  ;;  %v561_v32 = vclamps-f32 %v381_v17, 1.0  ;;  %v383_v37 = vadd.f32 %v586_v28, %v335_v21  ;;  %v338_v41 = vmul.f32 0.08, %v550_v33 }
  0x4b   :  { %v384_v38 = vadd.f32 %v587_v35, %v336_v24  ;;  %v385_v42 = vadd.f32 %v590_v36, %v337_v34  ;;  %v292_v45 = vor.u32 1065353216, %v276_v22  ;;  %v59_v35 = vadd.s32 72, %v798_v2 }
  0x4c   :  { %v562_v40 = vclamps-f32 %v382_v29, 1.0  ;;  %v563_v16 = vclamps-f32 %v383_v37, 1.0  ;;  %v386_v18 = vadd.f32 %v591_v30, %v338_v41  ;;  %v551_v48 = vadd.f32 -1.5, %v291_v44 }
  0x4d   :  { %v564_v25 = vclamps-f32 %v384_v38, 1.0  ;;  %v565_v28 = vclamps-f32 %v385_v42, 1.0  ;;  %v552_v49 = vadd.f32 -1.5, %v292_v45  ;;  %v595_v50 = vunpack.c.h.bf16 %v839_v13 }
  0x4e   :  { %v429_v47 = vpack.c.bf16 %v562_v40, %v561_v32  ;;  %v98_v36 = vmul.u32 2654435761, %v58_v43  ;;  %v566_v52 = vclamps-f32 %v386_v18, 1.0  ;;  %v99_v53 = vmul.u32 2654435761, %v59_v35 }
  0x4f   :  { %v430_v51 = vpack.c.bf16 %v564_v25, %v563_v16  ;;  %v598_v54 = vunpack.c.l.bf16 %v854_v46  ;;  %v339_v55 = vmul.f32 0.08, %v551_v48  ;;  %v340_v56 = vmul.f32 0.08, %v552_v49 }
  0x50   :  { %629 = vmatpush3.bf16.msra.mxu0 %v429_v47  ;;  %v115_v23 = vadd.s32 %v802_v6, %v98_v36  ;;  %v60_v30 = vadd.s32 80, %v798_v2  ;;  %v431_v58 = vpack.c.bf16 %v566_v52, %v565_v28  ;;  %v116_v59 = vadd.s32 %v802_v6, %v99_v53 }
  0x51   :  { %630 = vmatprep.subr.bf16.mxu0 %v734_v1  ;;  %v599_v60 = vunpack.c.h.bf16 %v854_v46  ;;  %v61_v61 = vadd.s32 88, %v798_v2  ;;  %v387_v62 = vadd.f32 %v594_v31, %v339_v55  ;;  %v388_v63 = vadd.f32 %v595_v50, %v340_v56 }
  0x52   :  { %v133_v0 = vadd.s32 %v805_v8, %v115_v23  ;;  %v100_v3 = vmul.u32 2654435761, %v60_v30  ;;  %v134_v4 = vadd.s32 %v805_v8, %v116_v59  ;;  %v602_v7 = vunpack.c.l.bf16 %v864_v57 }
  0x53   :  { %v101_v5 = vmul.u32 2654435761, %v61_v61  ;;  %v62_v9 = vadd.s32 96, %v798_v2  ;;  %v567_v10 = vclamps-f32 %v387_v62, 1.0  ;;  %v568_v11 = vclamps-f32 %v388_v63, 1.0 }
  0x54   :  { %631 = vmatpush3.bf16.msra.mxu0 %v430_v51  ;;  %v149_v12 = vshrl.u32 %v133_v0, 16  ;;  %v117_v13 = vadd.s32 %v802_v6, %v100_v3  ;;  %v150_v31 = vshrl.u32 %v134_v4, 16  ;;  %v63_v15 = vadd.s32 104, %v798_v2 }
  0x55   :  { %632 = vmatprep.subr.bf16.mxu0 %v734_v1  ;;  %v118_v14 = vadd.s32 %v802_v6, %v101_v5  ;;  %v102_v17 = vmul.u32 2654435761, %v62_v9  ;;  %v432_v20 = vpack.c.bf16 %v568_v11, %v567_v10  ;;  %v603_v26 = vunpack.c.h.bf16 %v864_v57 }
  0x56   :  { %v165_v21 = vxor.u32 %v149_v12, %v133_v0  ;;  %v135_v24 = vadd.s32 %v805_v8, %v117_v13  ;;  %v166_v27 = vxor.u32 %v150_v31, %v134_v4  ;;  %v103_v32 = vmul.u32 2654435761, %v63_v15 }
  0x57   :  { %v136_v29 = vadd.s32 %v805_v8, %v118_v14  ;;  %v119_v33 = vadd.s32 %v802_v6, %v102_v17  ;;  %v606_v38 = vunpack.c.l.bf16 %v879_v19  ;;  %v64_v39 = vadd.s32 112, %v798_v2 }
  0x58   :  { %633 = vmatpush3.bf16.msra.mxu0 %v431_v58  ;;  %v181_v34 = vmul.u32 2146121005, %v165_v21  ;;  %v151_v37 = vshrl.u32 %v135_v24, 16  ;;  %v182_v22 = vmul.u32 2146121005, %v166_v27  ;;  %v120_v41 = vadd.s32 %v802_v6, %v103_v32 }
  0x59   :  { %634 = vmatprep.subr.bf16.mxu0 %v734_v1  ;;  %v152_v40 = vshrl.u32 %v136_v29, 16  ;;  %v137_v42 = vadd.s32 %v805_v8, %v119_v33  ;;  %v65_v25 = vadd.s32 120, %v798_v2  ;;  %v104_v44 = vmul.u32 2654435761, %v64_v39 }
  0x5a   :  { %v197_v43 = vshrl.u32 %v181_v34, 15  ;;  %v167_v16 = vxor.u32 %v151_v37, %v135_v24  ;;  %v198_v45 = vshrl.u32 %v182_v22, 15  ;;  %v138_v18 = vadd.s32 %v805_v8, %v120_v41 }
  0x5b   :  { %v168_v47 = vxor.u32 %v152_v40, %v136_v29  ;;  %v153_v28 = vshrl.u32 %v137_v42, 16  ;;  %v105_v49 = vmul.u32 2654435761, %v65_v25  ;;  %v121_v50 = vadd.s32 %v802_v6, %v104_v44 }
  0x5c   :  { %635 = vmatpush3.bf16.msra.mxu0 %v432_v20  ;;  %v213_v35 = vxor.u32 %v197_v43, %v181_v34  ;;  %v183_v48 = vmul.u32 2146121005, %v167_v16  ;;  %v214_v36 = vxor.u32 %v198_v45, %v182_v22  ;;  %v154_v52 = vshrl.u32 %v138_v18, 16 }
  0x5d   :  { %636 = vmatprep.subr.bf16.mxu0 %v734_v1  ;;  %v184_v51 = vmul.u32 2146121005, %v168_v47  ;;  %v169_v53 = vxor.u32 %v153_v28, %v137_v42  ;;  %v122_v56 = vadd.s32 %v802_v6, %v105_v49  ;;  %v139_v23 = vadd.s32 %v805_v8, %v121_v50 }
  0x5e   :  { %v229_v55 = vmul.u32 2221713035, %v213_v35  ;;  %v199_v2 = vshrl.u32 %v183_v48, 15  ;;  %v230_v30 = vmul.u32 2221713035, %v214_v36  ;;  %v170_v59 = vxor.u32 %v154_v52, %v138_v18 }
  0x5f   :  { %v200_v58 = vshrl.u32 %v184_v51, 15  ;;  %v185_v61 = vmul.u32 2146121005, %v169_v53  ;;  %v140_v0 = vadd.s32 %v805_v8, %v122_v56  ;;  %v155_v3 = vshrl.u32 %v139_v23, 16 }
  0x60   :  { %v245_v62 = vshrl.u32 %v229_v55, 16  ;;  %v215_v63 = vxor.u32 %v199_v2, %v183_v48  ;;  %v246_v4 = vshrl.u32 %v230_v30, 16  ;;  %v186_v9 = vmul.u32 2146121005, %v170_v59 }
  0x61   :  { %v216_v5 = vxor.u32 %v200_v58, %v184_v51  ;;  %v201_v10 = vshrl.u32 %v185_v61, 15  ;;  %v156_v13 = vshrl.u32 %v140_v0, 16  ;;  %v171_v31 = vxor.u32 %v155_v3, %v139_v23 }
  0x62   :  { %v261_v11 = vxor.u32 %v245_v62, %v229_v55  ;;  %v231_v12 = vmul.u32 2221713035, %v215_v63  ;;  %v262_v6 = vxor.u32 %v246_v4, %v230_v30  ;;  %v202_v15 = vshrl.u32 %v186_v9, 15 }
  0x63   :  { %v232_v14 = vmul.u32 2221713035, %v216_v5  ;;  %v217_v17 = vxor.u32 %v201_v10, %v185_v61  ;;  %v172_v24 = vxor.u32 %v156_v13, %v140_v0  ;;  %v187_v27 = vmul.u32 2146121005, %v171_v31 }
  0x64   :  { %v277_v20 = vshrl.u32 %v261_v11, 9  ;;  %v247_v21 = vshrl.u32 %v231_v12, 16  ;;  %v278_v29 = vshrl.u32 %v262_v6, 9  ;;  %v218_v8 = vxor.u32 %v202_v15, %v186_v9  ;;  %v618_v15 = vld [vmem:[#allocation8 + $0x38] sm:$0xff]  }
  0x65   :  { %v248_v32 = vshrl.u32 %v232_v14, 16  ;;  %v233_v33 = vmul.u32 2221713035, %v217_v17  ;;  %v188_v39 = vmul.u32 2146121005, %v172_v24  ;;  %v203_v22 = vshrl.u32 %v187_v27, 15 }
  0x66   :  { %v293_v34 = vor.u32 1065353216, %v277_v20  ;;  %v263_v37 = vxor.u32 %v247_v21, %v231_v12  ;;  %v294_v40 = vor.u32 1065353216, %v278_v29  ;;  %v234_v42 = vmul.u32 2221713035, %v218_v8 }
  0x67   :  { %v264_v41 = vxor.u32 %v248_v32, %v232_v14  ;;  %v249_v43 = vshrl.u32 %v233_v33, 16  ;;  %v204_v44 = vshrl.u32 %v188_v39, 15  ;;  %v219_v45 = vxor.u32 %v203_v22, %v187_v27 }
  0x68   :  { %v553_v16 = vadd.f32 -1.5, %v293_v34  ;;  %v279_v25 = vshrl.u32 %v263_v37, 9  ;;  %v554_v47 = vadd.f32 -1.5, %v294_v40  ;;  %v250_v28 = vshrl.u32 %v234_v42, 16 }
  0x69   :  { %v280_v18 = vshrl.u32 %v264_v41, 9  ;;  %v265_v35 = vxor.u32 %v249_v43, %v233_v33  ;;  %v220_v50 = vxor.u32 %v204_v44, %v188_v39  ;;  %v235_v36 = vmul.u32 2221713035, %v219_v45  ;;  %v578_v44 = vld [vmem:[%s932_s3] ss:$0 sm:$0xff] }
  0x6a   :  { %v341_v48 = vmul.f32 0.08, %v553_v16  ;;  %v295_v49 = vor.u32 1065353216, %v279_v25  ;;  %v342_v51 = vmul.f32 0.08, %v554_v47  ;;  %v266_v53 = vxor.u32 %v250_v28, %v234_v42  ;;  %v657_v25 = vld [vmem:[#allocation5] sm:$0xff]  }
  0x6b   :  { %v296_v52 = vor.u32 1065353216, %v280_v18  ;;  %v281_v55 = vshrl.u32 %v265_v35, 9  ;;  %v236_v23 = vmul.u32 2221713035, %v220_v50  ;;  %v251_v30 = vshrl.u32 %v235_v36, 16 }
  0x6c   :  { %v389_v2 = vadd.f32 %v598_v54, %v341_v48  ;;  %v555_v56 = vadd.f32 -1.5, %v295_v49  ;;  %v390_v58 = vadd.f32 %v599_v60, %v342_v51  ;;  %v282_v61 = vshrl.u32 %v266_v53, 9  ;;  %v579_v47 = vld [vmem:[%s933_s4] ss:$0 sm:$0xff] }
  0x6d   :  { %v556_v59 = vadd.f32 -1.5, %v296_v52  ;;  %v297_v62 = vor.u32 1065353216, %v281_v55  ;;  %v252_v3 = vshrl.u32 %v236_v23, 16  ;;  %v267_v4 = vxor.u32 %v251_v30, %v235_v36 }
  0x6e   :  { %v569_v63 = vclamps-f32 %v389_v2, 1.0  ;;  %v343_v0 = vmul.f32 0.08, %v555_v56  ;;  %v570_v5 = vclamps-f32 %v390_v58, 1.0  ;;  %v298_v10 = vor.u32 1065353216, %v282_v61 }
  0x6f   :  { %v344_v9 = vmul.f32 0.08, %v556_v59  ;;  %v557_v11 = vadd.f32 -1.5, %v297_v62  ;;  %v607_v12 = vunpack.c.h.bf16 %v879_v19  ;;  %v268_v13 = vxor.u32 %v252_v3, %v236_v23 }
  0x70   :  { %v391_v54 = vadd.f32 %v602_v7, %v343_v0  ;;  %v283_v31 = vshrl.u32 %v267_v4, 9  ;;  %v433_v46 = vpack.c.bf16 %v570_v5, %v569_v63  ;;  %v558_v6 = vadd.f32 -1.5, %v298_v10 }
  0x71   :  { %v392_v60 = vadd.f32 %v603_v26, %v344_v9  ;;  %v345_v14 = vmul.f32 0.08, %v557_v11  ;;  %v284_v20 = vshrl.u32 %v268_v13, 9  ;;  %v610_v8 = vunpack.c.l.bf16 %v618_v15 }
  0x72   :  { %v571_v17 = vclamps-f32 %v391_v54, 1.0  ;;  %v299_v21 = vor.u32 1065353216, %v283_v31  ;;  %637 = vmatpush3.bf16.msra.mxu0 %v433_v46  ;;  %v346_v27 = vmul.f32 0.08, %v558_v6  ;;  %v611_v39 = vunpack.c.h.bf16 %v618_v15 }
  0x73   :  { %v572_v24 = vclamps-f32 %v392_v60, 1.0  ;;  %v393_v7 = vadd.f32 %v606_v38, %v345_v14  ;;  %638 = vmatprep.subr.bf16.mxu0 %v734_v1  ;;  %v300_v29 = vor.u32 1065353216, %v284_v20 }
  0x74   :  { %v559_v32 = vadd.f32 -1.5, %v299_v21  ;;  %v394_v57 = vadd.f32 %v607_v12, %v346_v27 }
  0x75   :  { %v434_v33 = vpack.c.bf16 %v572_v24, %v571_v17  ;;  %v573_v26 = vclamps-f32 %v393_v7, 1.0  ;;  %v560_v34 = vadd.f32 -1.5, %v300_v29 }
  0x76   :  { %v347_v37 = vmul.f32 0.08, %v559_v32  ;;  %v574_v22 = vclamps-f32 %v394_v57, 1.0 }
  0x77   :  { %639 = vmatpush3.bf16.msra.mxu0 %v434_v33  ;;  %v348_v40 = vmul.f32 0.08, %v560_v34 }
  0x78   :  { %640 = vmatprep.subr.bf16.mxu0 %v734_v1  ;;  %v395_v41 = vadd.f32 %v610_v8, %v347_v37  ;;  %v435_v42 = vpack.c.bf16 %v574_v22, %v573_v26 }
  0x79   :  { %v396_v19 = vadd.f32 %v611_v39, %v348_v40 }
  0x7a   :  { %v575_v38 = vclamps-f32 %v395_v41, 1.0 }
  0x7b   :  { %641 = vmatpush3.bf16.msra.mxu0 %v435_v42  ;;  %v576_v43 = vclamps-f32 %v396_v19, 1.0 }
  0x7c   :  { %642 = vmatprep.subr.bf16.mxu0 %v734_v1 }
  0x7d   :  { %v436_v16 = vpack.c.bf16 %v576_v43, %v575_v38 }
  0x7f   :  { %643 = vmatpush3.bf16.msra.mxu0 %v436_v16 }
  0x82   :  { %645 = vmatmul.mubr.bf16.vlgmr.msra.gmra.mrb[0].mxu0 %v657_v25 }
 0x155   :  { %v479_v45 = vpop.f32.mrb[0].mxu0 }
 0x156   :  { %v514_v18 = vmul.f32 %v578_v44, %v479_v45  ;;  %v646_v28 = vpop.f32.mrb[1].mxu0 }
 0x157   :  { %v482_v35 = vpop.f32.mrb[2].mxu0 }
 0x158   :  { %v523_v1 = vadd.f32 %v579_v47, %v514_v18  ;;  %v515_v48 = vmul.f32 %v578_v44, %v482_v35  ;;  %v647_v49 = vpop.f32.mrb[3].mxu0 }
 0x15a   :  { %525 = vst [vmem:[#allocation10] sm:$0xff] %v523_v1  ;;  %v524_v50 = vadd.f32 %v579_v47, %v515_v48 }
 0x15c   :  { %526 = vst [vmem:[#allocation10 + $0x8] sm:$0xff] %v524_v50 }
 0x15d   :  { %713 = shalt.err (!%p710_p6)
}
 0x15e   :  { %s714_s26 = scalar_lea.hbm %s934_s5, 256 }
 0x15f   :  { %p715_p7 = scmp.ne.s32.totalorder %s934_s5, %s714_s26  ;;  %p718_p8 = scmp.lt.u32.totalorder %s714_s26, %s934_s5 }
 0x161   :  { %p720_p9 = pnand %p718_p8, %p715_p7 }
 0x163   :  { %723 = shalt.err (!%p720_p9)
}
 0x164   :  { %s737_s6 = smov 128   ;;  %s738_s7 = smov 8  }
 0x165   :  { %538 = dma.vmem_to_hbm [thread:$0]  %s533_s24, 256, %s934_s5, [#allocation7], %s737_s6, %s737_s6, %s738_s7  }
 0x166   :  { %728 = dma.done.wait [#allocation7], 256  }
 0x167   :  { %729 = vsyncadd [#allocation7], 4294967040 }
 0x168   :  { %542 = vsyncpa [#allocation6], 1 }
 0x169   :  { %543 = vsyncpa [#allocation9], 1 }
 0x16a   :  { %544 = vsyncpa [#allocation7], 1 }

</bundles_post_ra>
